<compile_context>
chip_gen: v7x
topology: tpu7x:2x2x1
jax: 0.10.0
libtpu: 0.0.40
codegen_flags: <defaults>
</compile_context>

<pallas_src>
import functools

import jax
import jax.numpy as jnp
from jax.experimental import pallas as pl
from jax.experimental.pallas import tpu as pltpu


def _round_up(x, m):
    return ((x + m - 1) // m) * m


def _vmem_limit_bytes():
    # Generation-aware cap (v5e/v6e: 128 MiB, v7x: 64 MiB); ~75% of capacity.
    cap = 64 * 1024 * 1024
    try:
        cap = int(pltpu.get_tpu_info().vmem_capacity_bytes)
    except Exception:
        pass
    return int(cap * 3 // 4)


# ----------------------------------------------------------------------------
# Pallas kernel: online-logsumexp over contrast columns + per-row finalize
# ----------------------------------------------------------------------------
def _supcon_kernel(a_ref, ct_ref, sms_ref, cnt_ref, out_ref, m_scr, d_scr, *,
                   t_over_bt, tm, tn, col_limit):
    i = pl.program_id(0)
    j = pl.program_id(1)

    @pl.when(j == 0)
    def _():
        m_scr[...] = jnp.full_like(m_scr, -1e30)
        d_scr[...] = jnp.zeros_like(d_scr)

    # [TM, D] x [D, TN] on the MXU, f32 accumulation (1/T pre-folded into a).
    s = jnp.dot(a_ref[...], ct_ref[...], preferred_element_type=jnp.float32)

    # Column predicates from a lane iota + a [TM, 1] sublane iota only.
    col = jax.lax.broadcasted_iota(jnp.int32, (tm, tn), 1)
    row_off = jax.lax.broadcasted_iota(jnp.int32, (tm, 1), 0) + (i * tm - j * tn)
    allowed = (col < (col_limit - j * tn)) & (col != row_off)

    # Online logsumexp over allowed columns (torch's row-max cancels exactly
    # in mean_log_prob_pos, so only this LSE is needed).
    sm = jnp.where(allowed, s, jnp.float32(-1e30))
    m_prev = m_scr[...]
    m_new = jnp.maximum(m_prev, jnp.max(sm, axis=1, keepdims=True))
    p_sum = jnp.sum(jnp.exp(sm - m_new), axis=1, keepdims=True)
    d_scr[...] = d_scr[...] * jnp.exp(m_prev - m_new) + p_sum
    m_scr[...] = m_new

    @pl.when(j == pl.num_programs(1) - 1)
    def _():
        lse = m_scr[...] + jnp.log(d_scr[...])                     # [TM, 1]
        cnt = cnt_ref[...]                                         # [TM, 1]
        denom = jnp.where(cnt < 1e-6, 1.0, cnt)
        mean_log_prob_pos = (sms_ref[...] - cnt * lse) / denom     # exact div
        out_ref[...] = (-t_over_bt) * mean_log_prob_pos


def _supcon_pallas(a_pad, ct_pad, sms_pad, cnt_pad, *, t_over_bt, col_limit, tm, tn):
    m_pad, d_pad = a_pad.shape
    _, n_pad = ct_pad.shape
    grid = (m_pad // tm, n_pad // tn)

    kernel = functools.partial(
        _supcon_kernel, t_over_bt=float(t_over_bt),
        tm=int(tm), tn=int(tn), col_limit=int(col_limit))

    flops = 2 * m_pad * n_pad * d_pad
    transcendentals = m_pad * n_pad + 4 * m_pad
    bytes_accessed = (m_pad * d_pad * 2                 # anchors
                      + grid[0] * n_pad * d_pad * 2     # contrast^T re-streamed per row tile
                      + 3 * m_pad * 4)                  # stats + output

    return pl.pallas_call(
        kernel,
        out_shape=jax.ShapeDtypeStruct((m_pad, 1), jnp.float32),
        grid=grid,
        in_specs=[
            pl.BlockSpec((tm, d_pad), lambda i, j: (i, 0)),   # anchors (j-invariant)
            pl.BlockSpec((d_pad, tn), lambda i, j: (0, j)),   # contrast^T column panel
            pl.BlockSpec((tm, 1), lambda i, j: (i, 0)),       # sum(m*s) per row
            pl.BlockSpec((tm, 1), lambda i, j: (i, 0)),       # positive count per row
        ],
        out_specs=pl.BlockSpec((tm, 1), lambda i, j: (i, 0)),
        scratch_shapes=[pltpu.VMEM((tm, 1), jnp.float32),     # running max
                        pltpu.VMEM((tm, 1), jnp.float32)],    # running exp-sum
        compiler_params=pltpu.CompilerParams(
            dimension_semantics=("parallel", "arbitrary"),
            vmem_limit_bytes=_vmem_limit_bytes()),
        cost_estimate=pl.CostEstimate(
            flops=flops, transcendentals=transcendentals,
            bytes_accessed=bytes_accessed),
    )(a_pad, ct_pad, sms_pad, cnt_pad)


# ----------------------------------------------------------------------------
# Plain-JAX glue: sparse positive-index table (labels only)
# ----------------------------------------------------------------------------
def _positive_index_table(labels, B, k, use_tcl, key):
    """Returns [2B, k+1(+1)] int32: k random non-aug positives, the aug partner,
    and (if use_tcl) the prototype column.  -1 marks an invalid entry."""
    M = 2 * B
    k = int(min(k, M))
    lab2 = jnp.concatenate([labels, labels], axis=0)
    rows = jnp.arange(M)
    same_label = lab2[:, None] == lab2[None, :]
    same_sample = (rows[:, None] % B) == (rows[None, :] % B)      # aug pairs + self
    cand = same_label & jnp.logical_not(same_sample)              # torch mask_noself
    # TODO(synk): torch draws a per-row randperm; uniform scores + top_k matches the
    # distribution (k positives uniformly without replacement) but is not bit-exact.
    scores = jnp.where(cand, jax.random.uniform(key, (M, M)), -jnp.inf)
    vals, idx = jax.lax.top_k(scores, k)
    sel = jnp.where(vals > -jnp.inf, idx, -1).astype(jnp.int32)   # [M, k]
    aug_col = jnp.where(rows < B, rows + B, rows - B).astype(jnp.int32)[:, None]
    cols = [sel, aug_col]
    if use_tcl:
        proto_col = (M + lab2).astype(jnp.int32)[:, None]
        cols.append(proto_col)
    return jnp.concatenate(cols, axis=1)


# ----------------------------------------------------------------------------
# Module-equivalent forward
# ----------------------------------------------------------------------------
def supcon_loss_kcl_tsc(features, labels, prototypes, *, temperature=0.07,
                        contrast_mode='all', base_temperature=0.07,
                        use_tcl=False, k=3, key=None,
                        row_tile=512, col_tile=512):
    # TODO(synk): contrast_mode='one' and the labels=None / explicit-mask (SimCLR)
    # degenerate paths of the torch module are not implemented.
    assert contrast_mode == 'all'
    if features.ndim > 3:
        features = features.reshape(features.shape[0], features.shape[1], -1)
    assert features.ndim == 3, "`features` must be [bsz, n_views, D]"
    if key is None:
        key = jax.random.PRNGKey(0)

    B, n_views, D = features.shape
    assert n_views == 2, "mask logic assumes exactly 2 views"
    M = 2 * B
    n_proto = prototypes.shape[0]
    N_real = M + n_proto
    inv_t = float(1.0 / temperature)

    # --- operands: quantize ONCE to bf16; the same rounded values feed the MXU
    #     and the sparse positive numerator, so numerator/denominator share precision.
    cf = jnp.concatenate([features[:, v, :] for v in range(n_views)], axis=0)   # [M, D]
    cfull = jnp.concatenate([cf, prototypes.astype(cf.dtype)], axis=0)          # [N_real, D]
    cfull_bf = cfull.astype(jnp.bfloat16)
    cfull_q = cfull_bf.astype(jnp.float32)
    a_bf = (cfull_q[:M] * inv_t).astype(jnp.bfloat16)                           # anchors * 1/T
    a_q = a_bf.astype(jnp.float32)

    # --- sparse positives: gather-sum instead of a dense [M, N] mask ----------
    idx_all = _positive_index_table(labels, B, k, use_tcl, key)                  # [M, W]
    valid = idx_all >= 0
    gathered = jnp.take(cfull_q, jnp.clip(idx_all, 0, N_real - 1), axis=0)       # [M, W, D]
    pos_sum = jnp.sum(gathered * valid[..., None].astype(jnp.float32), axis=1)   # [M, D]
    cnt = jnp.sum(valid, axis=1).astype(jnp.float32)                             # [M]
    sum_ms = jnp.sum(a_q * pos_sum, axis=1)                                      # [M] (already /T)

    # --- tiling / padding -----------------------------------------------------
    m8 = _round_up(M, 8)
    TM = min(int(row_tile), m8)
    if m8 >= 16 and (M + TM - 1) // TM < 2:
        TM = _round_up((m8 + 1) // 2, 8)          # >= 2 row tiles for v7x megacore
    M_pad = _round_up(M, TM)
    TN = min(int(col_tile), _round_up(N_real, 128))
    N_pad = _round_up(N_real, TN)
    D_pad = _round_up(D, 128)

    a_pad = jnp.zeros((M_pad, D_pad), jnp.bfloat16).at[:M, :D].set(a_bf)
    ct_pad = jnp.zeros((D_pad, N_pad), jnp.bfloat16).at[:D, :N_real].set(cfull_bf.T)
    sms_pad = jnp.zeros((M_pad, 1), jnp.float32).at[:M, 0].set(sum_ms)
    cnt_pad = jnp.zeros((M_pad, 1), jnp.float32).at[:M, 0].set(cnt)

    col_limit = N_real if use_tcl else M
    per_anchor = _supcon_pallas(
        a_pad, ct_pad, sms_pad, cnt_pad,
        t_over_bt=float(temperature / base_temperature),
        col_limit=col_limit, tm=TM, tn=TN)                                       # [M_pad, 1]

    # loss.view(anchor_count, batch_size).mean() == mean over all 2B anchors
    return jnp.sum(per_anchor[:M, 0]) / M


# ----------------------------------------------------------------------------
# Pure-JAX reference: direct transcription of the torch forward
# ----------------------------------------------------------------------------
def _reference_loss(features, labels, prototypes, *, temperature, base_temperature,
                    use_tcl, k, key, quantized_operands):
    f32 = jnp.float32
    B, V, D = features.shape
    M = 2 * B
    n_proto = prototypes.shape[0]
    inv_t = float(1.0 / temperature)

    cf = jnp.concatenate([features[:, v, :] for v in range(V)], axis=0)
    cfull = jnp.concatenate([cf, prototypes.astype(cf.dtype)], axis=0)
    if quantized_operands:   # mirror the kernel's bf16 operand rounding exactly
        cq = cfull.astype(jnp.bfloat16).astype(f32)
        aq = (cq[:M] * inv_t).astype(jnp.bfloat16).astype(f32)
        s = jnp.matmul(aq, cq.T, precision=jax.lax.Precision.HIGHEST)  # already /T
    else:
        s = jnp.matmul(cf, cfull.T, precision=jax.lax.Precision.HIGHEST) / temperature

    logits_max = jnp.max(s, axis=1, keepdims=True)
    logits = s - logits_max

    mask = jnp.tile((labels[:, None] == labels[None, :]).astype(f32), (2, 2))
    mask_augs = jnp.tile(jnp.eye(B, dtype=f32), (2, 2))
    logits_mask = 1.0 - jnp.eye(M, dtype=f32)
    mask_augs = mask_augs * logits_mask

    idx_tab = _positive_index_table(labels, B, k, use_tcl, key)
    sel = idx_tab[:, :k]                                                   # random positives
    sel_onehot = jnp.sum(
        (sel[..., None] == jnp.arange(M)[None, None, :]).astype(f32)
        * (sel >= 0)[..., None].astype(f32), axis=1)                       # [M, M]
    new_pos_mask = mask_augs + sel_onehot
    mask = new_pos_mask * logits_mask
    if use_tcl:
        anchor_labels = jnp.concatenate([labels, labels], axis=0)
        proto_mask = jax.nn.one_hot(anchor_labels, n_proto, dtype=f32)
        mask = jnp.concatenate([mask, proto_mask], axis=1)
        lmask = jnp.concatenate([logits_mask, jnp.ones((M, n_proto), f32)], axis=1)
    else:
        logits = logits[:, :M]
        lmask = logits_mask
    mask = jnp.minimum(mask, 1.0)

    exp_logits = jnp.exp(logits) * lmask
    log_prob = logits - jnp.log(jnp.sum(exp_logits, axis=1, keepdims=True))
    pos = jnp.sum(mask, axis=1)
    pos = jnp.where(pos < 1e-6, 1.0, pos)
    mlpp = jnp.sum(mask * log_prob, axis=1) / pos
    return jnp.mean(-(temperature / base_temperature) * mlpp)


if __name__ == "__main__":
    key = jax.random.PRNGKey(0)
    k_feat, k_lab, k_proto, k_sel = jax.random.split(key, 4)

    B, n_views, D = 4, 2, 128  # D=128 matches the module's prototype buffer
    feats = jax.random.normal(k_feat, (B, n_views, D), dtype=jnp.float32)
    feats = feats / jnp.linalg.norm(feats, axis=-1, keepdims=True)
    labels = jax.random.randint(k_lab, (B,), 0, 2)

    # deterministic stand-in for generate_random_vector_and_negative(128)
    v = jax.random.normal(k_proto, (D,), dtype=jnp.float32)
    v = v / jnp.linalg.norm(v)
    prototypes = jnp.stack([v, -v]).astype(jnp.float32)

    for tcl in (False, True):
        loss = supcon_loss_kcl_tsc(feats, labels, prototypes,
                                   temperature=0.07, base_temperature=0.07,
                                   use_tcl=tcl, k=3, key=k_sel)
        loss = jax.block_until_ready(loss)
        assert jnp.isfinite(loss), f"non-finite loss (tcl={tcl}): {loss}"
        loss = float(loss)

        # Tight check: reference with the SAME bf16 operand rounding -> validates the
        # kernel math (online LSE, row-max cancellation, fused mean_log_prob algebra).
        ref_q = float(_reference_loss(feats, labels, prototypes,
                                      temperature=0.07, base_temperature=0.07,
                                      use_tcl=tcl, k=3, key=k_sel,
                                      quantized_operands=True))
        assert abs(loss - ref_q) <= 2e-3 + 2e-3 * abs(ref_q), (tcl, loss, ref_q)

        # Looser check vs the pure-f32 torch formula -> bounds the bf16 operand policy.
        ref_f = float(_reference_loss(feats, labels, prototypes,
                                      temperature=0.07, base_temperature=0.07,
                                      use_tcl=tcl, k=3, key=k_sel,
                                      quantized_operands=False))
        assert abs(loss - ref_f) <= 8e-2 + 3e-2 * abs(ref_f), (tcl, loss, ref_f)

    print("KERNEL_OK")
</pallas_src>

<mosaic_0001>
module attributes {stable_mosaic.version = 11 : i64} {
  func.func @_supcon_kernel(%arg0: i32, %arg1: i32, %arg2: memref<8x128xbf16, #tpu.memory_space<vmem>>, %arg3: memref<128x128xbf16, #tpu.memory_space<vmem>>, %arg4: memref<8x1xf32, #tpu.memory_space<vmem>>, %arg5: memref<8x1xf32, #tpu.memory_space<vmem>>, %arg6: memref<8x1xf32, #tpu.memory_space<vmem>>, %arg7: memref<8x1xf32, #tpu.memory_space<vmem>>, %arg8: memref<8x1xf32, #tpu.memory_space<vmem>>) attributes {dimension_semantics = [#tpu.dimension_semantics<parallel>, #tpu.dimension_semantics<arbitrary>], iteration_bounds = array<i64: 1, 1>, scalar_prefetch = 0 : i64, scratch_operands = 2 : i64, tpu.core_type = #tpu.core_type<tc>, window_params = [{transform_indices = @transform_0, window_bounds = array<i64: 8, 128>}, {transform_indices = @transform_1, window_bounds = array<i64: 128, 128>}, {transform_indices = @transform_2, window_bounds = array<i64: 8, 1>}, {transform_indices = @transform_3, window_bounds = array<i64: 8, 1>}, {transform_indices = @transform_4, window_bounds = array<i64: 8, 1>}]} {
    %c0_i32 = arith.constant 0 : i32
    %0 = arith.cmpi eq, %arg1, %c0_i32 : i32
    %1 = arith.extui %0 : i1 to i32
    %c0_i32_0 = arith.constant 0 : i32
    %2 = arith.cmpi ne, %1, %c0_i32_0 : i32
    scf.if %2 {
      %cst_19 = arith.constant -1.000000e+30 : f32
      %41 = vector.broadcast %cst_19 : f32 to vector<8x1xf32>
      %c0_20 = arith.constant 0 : index
      %c0_21 = arith.constant 0 : index
      %42 = vector.load %arg7[%c0_20, %c0_21] : memref<8x1xf32, #tpu.memory_space<vmem>>, vector<8x1xf32>
      tpu.vector_store %arg7[%c0_20, %c0_21], %41 {strides = array<i32>} : memref<8x1xf32, #tpu.memory_space<vmem>>, vector<8x1xf32>,
      %cst_22 = arith.constant 0.000000e+00 : f32
      %43 = vector.broadcast %cst_22 : f32 to vector<8x1xf32>
      %c0_23 = arith.constant 0 : index
      %c0_24 = arith.constant 0 : index
      %44 = vector.load %arg8[%c0_23, %c0_24] : memref<8x1xf32, #tpu.memory_space<vmem>>, vector<8x1xf32>
      tpu.vector_store %arg8[%c0_23, %c0_24], %43 {strides = array<i32>} : memref<8x1xf32, #tpu.memory_space<vmem>>, vector<8x1xf32>,
    } else {
    }
    %c0 = arith.constant 0 : index
    %c0_1 = arith.constant 0 : index
    %3 = vector.load %arg2[%c0, %c0_1] : memref<8x128xbf16, #tpu.memory_space<vmem>>, vector<8x128xbf16>
    %c0_2 = arith.constant 0 : index
    %c0_3 = arith.constant 0 : index
    %4 = vector.load %arg3[%c0_2, %c0_3] : memref<128x128xbf16, #tpu.memory_space<vmem>>, vector<128x128xbf16>
    %cst = arith.constant dense<0.000000e+00> : vector<8x128xf32>
    %5 = tpu.matmul %3, %4, %cst {dimension_numbers = #tpu.dot_dimension_numbers<[1], [0], [0], [1], [0, 0, 1, 1], [], []>} : vector<8x128xbf16>, vector<128x128xbf16>, vector<8x128xf32> -> vector<8x128xf32>
    %6 = tpu.iota {dimensions = array<i32: 1>} : vector<8x128xi32>
    %7 = tpu.iota {dimensions = array<i32: 0>} : vector<8x1xi32>
    %c8_i32 = arith.constant 8 : i32
    %8 = arith.muli %arg0, %c8_i32 : i32
    %c128_i32 = arith.constant 128 : i32
    %9 = arith.muli %arg1, %c128_i32 : i32
    %10 = arith.subi %8, %9 : i32
    %11 = vector.broadcast %10 : i32 to vector<8x1xi32>
    %12 = arith.addi %7, %11 : vector<8x1xi32>
    %c128_i32_4 = arith.constant 128 : i32
    %13 = arith.muli %arg1, %c128_i32_4 : i32
    %c8_i32_5 = arith.constant 8 : i32
    %14 = arith.subi %c8_i32_5, %13 : i32
    %15 = vector.broadcast %14 : i32 to vector<8x128xi32>
    %16 = arith.cmpi slt, %6, %15 : vector<8x128xi32>
    %17 = vector.broadcast %12 : vector<8x1xi32> to vector<8x128xi32>
    %18 = arith.cmpi ne, %6, %17 : vector<8x128xi32>
    %19 = arith.andi %16, %18 : vector<8x128xi1>
    %cst_6 = arith.constant -1.000000e+30 : f32
    %20 = vector.broadcast %cst_6 : f32 to vector<8x128xf32>
    %21 = arith.select %19, %5, %20 : vector<8x128xi1>, vector<8x128xf32>
    %c0_7 = arith.constant 0 : index
    %c0_8 = arith.constant 0 : index
    %22 = vector.load %arg7[%c0_7, %c0_8] : memref<8x1xf32, #tpu.memory_space<vmem>>, vector<8x1xf32>
    %cst_9 = arith.constant dense<0xFF800000> : vector<8xf32>
    %23 = vector.multi_reduction <maximumf>, %21, %cst_9 [1] : vector<8x128xf32> to vector<8xf32>
    %24 = vector.shape_cast %23 : vector<8xf32> to vector<8x1xf32>
    %25 = arith.maximumf %22, %24 : vector<8x1xf32>
    %26 = vector.broadcast %25 : vector<8x1xf32> to vector<8x128xf32>
    %27 = arith.subf %21, %26 : vector<8x128xf32>
    %28 = math.exp %27 : vector<8x128xf32>
    %cst_10 = arith.constant dense<0.000000e+00> : vector<8xf32>
    %29 = vector.multi_reduction <add>, %28, %cst_10 [1] : vector<8x128xf32> to vector<8xf32>
    %30 = vector.shape_cast %29 : vector<8xf32> to vector<8x1xf32>
    %c0_11 = arith.constant 0 : index
    %c0_12 = arith.constant 0 : index
    %31 = vector.load %arg8[%c0_11, %c0_12] : memref<8x1xf32, #tpu.memory_space<vmem>>, vector<8x1xf32>
    %32 = arith.subf %22, %25 : vector<8x1xf32>
    %33 = math.exp %32 : vector<8x1xf32>
    %34 = arith.mulf %31, %33 : vector<8x1xf32>
    %35 = arith.addf %34, %30 : vector<8x1xf32>
    %c0_13 = arith.constant 0 : index
    %c0_14 = arith.constant 0 : index
    %36 = vector.load %arg8[%c0_13, %c0_14] : memref<8x1xf32, #tpu.memory_space<vmem>>, vector<8x1xf32>
    tpu.vector_store %arg8[%c0_13, %c0_14], %35 {strides = array<i32>} : memref<8x1xf32, #tpu.memory_space<vmem>>, vector<8x1xf32>,
    %c0_15 = arith.constant 0 : index
    %c0_16 = arith.constant 0 : index
    %37 = vector.load %arg7[%c0_15, %c0_16] : memref<8x1xf32, #tpu.memory_space<vmem>>, vector<8x1xf32>
    tpu.vector_store %arg7[%c0_15, %c0_16], %25 {strides = array<i32>} : memref<8x1xf32, #tpu.memory_space<vmem>>, vector<8x1xf32>,
    %c0_i32_17 = arith.constant 0 : i32
    %38 = arith.cmpi eq, %arg1, %c0_i32_17 : i32
    %39 = arith.extui %38 : i1 to i32
    %c0_i32_18 = arith.constant 0 : i32
    %40 = arith.cmpi ne, %39, %c0_i32_18 : i32
    scf.if %40 {
      %c0_19 = arith.constant 0 : index
      %c0_20 = arith.constant 0 : index
      %41 = vector.load %arg7[%c0_19, %c0_20] : memref<8x1xf32, #tpu.memory_space<vmem>>, vector<8x1xf32>
      %c0_21 = arith.constant 0 : index
      %c0_22 = arith.constant 0 : index
      %42 = vector.load %arg8[%c0_21, %c0_22] : memref<8x1xf32, #tpu.memory_space<vmem>>, vector<8x1xf32>
      %43 = math.log %42 : vector<8x1xf32>
      %44 = arith.addf %41, %43 : vector<8x1xf32>
      %c0_23 = arith.constant 0 : index
      %c0_24 = arith.constant 0 : index
      %45 = vector.load %arg5[%c0_23, %c0_24] : memref<8x1xf32, #tpu.memory_space<vmem>>, vector<8x1xf32>
      %cst_25 = arith.constant 9.99999997E-7 : f32
      %46 = vector.broadcast %cst_25 : f32 to vector<8x1xf32>
      %47 = arith.cmpf olt, %45, %46 : vector<8x1xf32>
      %cst_26 = arith.constant 1.000000e+00 : f32
      %48 = vector.broadcast %cst_26 : f32 to vector<8x1xf32>
      %49 = arith.select %47, %48, %45 : vector<8x1xi1>, vector<8x1xf32>
      %c0_27 = arith.constant 0 : index
      %c0_28 = arith.constant 0 : index
      %50 = vector.load %arg4[%c0_27, %c0_28] : memref<8x1xf32, #tpu.memory_space<vmem>>, vector<8x1xf32>
      %51 = arith.mulf %45, %44 : vector<8x1xf32>
      %52 = arith.subf %50, %51 : vector<8x1xf32>
      %53 = arith.divf %52, %49 : vector<8x1xf32>
      %cst_29 = arith.constant -1.000000e+00 : f32
      %54 = vector.broadcast %cst_29 : f32 to vector<8x1xf32>
      %55 = arith.mulf %54, %53 : vector<8x1xf32>
      %c0_30 = arith.constant 0 : index
      %c0_31 = arith.constant 0 : index
      %56 = vector.load %arg6[%c0_30, %c0_31] : memref<8x1xf32, #tpu.memory_space<vmem>>, vector<8x1xf32>
      tpu.vector_store %arg6[%c0_30, %c0_31], %55 {strides = array<i32>} : memref<8x1xf32, #tpu.memory_space<vmem>>, vector<8x1xf32>,
    } else {
    }
    return
  }
  func.func @transform_0(%arg0: i32, %arg1: i32) -> (i32, i32) {
    %c0_i32 = arith.constant 0 : i32
    %c0_i32_0 = arith.constant 0 : i32
    return %arg0, %c0_i32 : i32, i32
  }
  func.func @transform_1(%arg0: i32, %arg1: i32) -> (i32, i32) {
    %c0_i32 = arith.constant 0 : i32
    %c0_i32_0 = arith.constant 0 : i32
    return %c0_i32, %arg1 : i32, i32
  }
  func.func @transform_2(%arg0: i32, %arg1: i32) -> (i32, i32) {
    %c0_i32 = arith.constant 0 : i32
    %c0_i32_0 = arith.constant 0 : i32
    return %arg0, %c0_i32 : i32, i32
  }
  func.func @transform_3(%arg0: i32, %arg1: i32) -> (i32, i32) {
    %c0_i32 = arith.constant 0 : i32
    %c0_i32_0 = arith.constant 0 : i32
    return %arg0, %c0_i32 : i32, i32
  }
  func.func @transform_4(%arg0: i32, %arg1: i32) -> (i32, i32) {
    %c0_i32 = arith.constant 0 : i32
    %c0_i32_0 = arith.constant 0 : i32
    return %arg0, %c0_i32 : i32, i32
  }
}

</mosaic_0001>

<bundles_post_ra>
// kernel: tpu_custom_call.1
= control target key start
LH: loop header
LB: loop body
LE: loop exit
PB: predicated region body
PF: predicated region fallthrough
CT: control target
= control target key end

     0   :  { %9 = vsyncpa [#allocation5], 0  ;;  %s290_s15 = smov [#allocation4]   ;;  %s351_s0 = inlined_call_operand.vmem [shape: bf16[8,128], index: 0, kind: input, shape index: {}]   ;;  %s352_s1 = inlined_call_operand.hbm [shape: bf16[128,128], index: 1, kind: input, shape index: {}]   ;;  %s353_s2 = inlined_call_operand.vmem [shape: f32[8,1], index: 2, kind: input, shape index: {}]   ;;  %s354_s3 = inlined_call_operand.vmem [shape: f32[8,1], index: 3, kind: input, shape index: {}]   ;;  %s355_s4 = inlined_call_operand.vmem [shape: f32[8,1], index: 4, kind: output, shape index: {}]  }
   0x1   :  { %s17_s16 = sshll.u32 %s290_s15, 4  ;;  %s266_s19 = scalar_lea.hbm %s352_s1, 1024  ;;  %s18_s16 = int_to_ptr.vmem [resolvable:$true] %s17_s16 }
   0x2   :  { %p267_p0 = scmp.ne.s32.totalorder %s352_s1, %s266_s19  ;;  %p270_p1 = scmp.lt.u32.totalorder %s266_s19, %s352_s1 }
   0x4   :  { %p272_p2 = pnand %p270_p1, %p267_p0 }
   0x6   :  { %275 = shalt.err (!%p272_p2)
}
   0x7   :  { %s276_s24 = scalar_lea.vmem %s18_s16, 1024  ;;  %p281_p4 = scmp.lt.s32.totalorder %s18_s16, %s18_s16 }
   0x8   :  { %p277_p3 = scmp.ne.s32.totalorder %s18_s16, %s276_s24  ;;  %p282_p5 = scmp.lt.s32.totalorder %s276_s24, %s276_s24 }
   0xa   :  { %p283_p6 = por %p282_p5, %p281_p4 }
   0xc   :  { %p284_p7 = pnand %p283_p6, %p277_p3 }
   0xe   :  { %287 = shalt.err (!%p284_p7)
}
   0xf   :  { %s291_s25 = smov 64   ;;  %s292_s26 = smov 4  }
  0x10   :  { %23 = dma.hbm_to_vmem [thread:$0]  %s352_s1, 1024, %s18_s16, [#allocation5], %s291_s25, %s291_s25, %s292_s26  }
  0x11   :  { %288 = dma.done.wait [#allocation5], 1024  }
  0x12   :  { %289 = vsyncadd [#allocation5], 4294966272  ;;  %v293_v0 = vmov 0.0   ;;  %vm294_vm0 = vmmov 0   ;;  %v250_v1 = vld [vmem:[#allocation4] sm:$0xff]   ;;  %v251_v2 = vld [vmem:[#allocation4 + $0x8] sm:$0xff]   ;;  %v144_v11 = vlaneseq }
  0x13   :  { %222 = vmatprep.subr.bf16.mxu0 %v293_v0  ;;  %238 = vmatprep.mubr.msk.bf16.mxu0 %vm294_vm0, %v293_v0  ;;  %v252_v3 = vld [vmem:[#allocation4 + $0x10] sm:$0xff]   ;;  %v253_v4 = vld [vmem:[#allocation4 + $0x18] sm:$0xff]   ;;  %v254_v5 = vld [vmem:[#allocation4 + $0x20] sm:$0xff]   ;;  %vm36_vm1 = vcmask 7168   ;;  %v295_v10 = vmov -1e+30  }
  0x14   :  { %223 = vmatpush3.bf16.msra.mxu0 %v250_v1  ;;  %v255_v6 = vld [vmem:[#allocation4 + $0x28] sm:$0xff]   ;;  %v256_v7 = vld [vmem:[#allocation4 + $0x30] sm:$0xff]   ;;  %v257_v8 = vld [vmem:[#allocation4 + $0x38] sm:$0xff]   ;;  %37 = vst.msk [vmem:[#allocation2] sm:$0xff] %vm36_vm1, %v295_v10  ;;  %v145_v12 = vand.u32 127, %v144_v11  ;;  %v147_v13 = vshrl.u32 %v144_v11, 7 }
  0x15   :  { %224 = vmatprep.subr.bf16.mxu0 %v293_v0  ;;  %v39_v9 = vld [vmem:[%s351_s0] sm:$0xf]  ;;  %38 = vst.msk [vmem:[#allocation3] sm:$0xff] %vm36_vm1, %v293_v0  ;;  %v296_v19 = vmov 0  }
  0x16   :  { %vm155_vm2 = vcmp.lt.s32.totalorder %v145_v12, 8  ;;  %vm156_vm3 = vcmp.ne.s32.totalorder %v145_v12, %v147_v13  ;;  %249 = vset.pattern.permute.xlu0 %v296_v19  ;;  %v190_v34 = vld [vmem:[%s354_s3] sm:$0xff] }
  0x17   :  { %vm157_vm4 = vmand %vm155_vm2, %vm156_vm3  ;;  %vm191_vm5 = vcmp.lt.f32.partialorder %v190_v34, 1e-06  ;;  %v193_v41 = vld [vmem:[%s353_s2] sm:$0xff] }
  0x18   :  { %225 = vmatpush3.bf16.msra.mxu0 %v251_v2  ;;  %v192_v36 = vsel %vm191_vm5, 1.0, %v190_v34 }
  0x19   :  { %226 = vmatprep.subr.bf16.mxu0 %v293_v0 }
  0x1b   :  { %v159_v20 = vld [vmem:[#allocation2] sm:$0xff] }
  0x1c   :  { %227 = vmatpush3.bf16.msra.mxu0 %v252_v3  ;;  %v173_v30 = vld [vmem:[#allocation3] sm:$0xff] }
  0x1d   :  { %228 = vmatprep.subr.bf16.mxu0 %v293_v0 }
  0x20   :  { %229 = vmatpush3.bf16.msra.mxu0 %v253_v4 }
  0x21   :  { %230 = vmatprep.subr.bf16.mxu0 %v293_v0 }
  0x24   :  { %231 = vmatpush3.bf16.msra.mxu0 %v254_v5 }
  0x25   :  { %232 = vmatprep.subr.bf16.mxu0 %v293_v0 }
  0x28   :  { %233 = vmatpush3.bf16.msra.mxu0 %v255_v6 }
  0x29   :  { %234 = vmatprep.subr.bf16.mxu0 %v293_v0 }
  0x2c   :  { %235 = vmatpush3.bf16.msra.mxu0 %v256_v7 }
  0x2d   :  { %236 = vmatprep.subr.bf16.mxu0 %v293_v0 }
  0x30   :  { %237 = vmatpush3.bf16.msra.mxu0 %v257_v8 }
  0x33   :  { %239 = vmatmul.mubr.bf16.vlgmr.msra.gmra.mrb[0].mxu0 %v39_v9 }
 0x106   :  { %v138_v14 = vpop.f32.mrb[0].mxu0 }
 0x107   :  { %v240_v15 = vpop.f32.mrb[1].mxu0  ;;  %v158_v16 = vsel %vm157_vm4, %v138_v14, -1e+30 }
 0x108   :  { %160 = vmax.xlane.f32.xlu0 %v158_v16  ;;  %v141_v17 = vpop.f32.mrb[2].mxu0 }
 0x109   :  { %v241_v18 = vpop.f32.mrb[3].mxu0 }
 0x195   :  { %v161_v21 = vpop.xlane.xlu0 %160 }
 0x196   :  { %v162_v22 = vmax.f32 %v159_v20, %v161_v21 }
 0x198   :  { %v174_v23 = vsub.f32 %v159_v20, %v162_v22  ;;  %181 = vst.msk [vmem:[#allocation2] sm:$0xff] %vm36_vm1, %v162_v22  ;;  %165 = vperm.xlu0 %249, %v162_v22  }
 0x19a   :  { %v175_v28 = vmul.f32 1.442695, %v174_v23 }
 0x19f   :  { %v185_v39 = vld [vmem:[#allocation2] sm:$0xff] }
 0x217   :  { %v166_v24 = vpop.permute.xlu0 %165 }
 0x218   :  { %v168_v25 = vsub.f32 %v158_v16, %v166_v24 }
 0x21a   :  { %v169_v26 = vmul.f32 1.442695, %v168_v25 }
 0x21c   :  { %258 = vpow2.f32 %v169_v26 }
 0x21d   :  { %260 = vpow2.f32 %v175_v28 }
 0x226   :  { %v259_v27 = vpop.eup %258 }
 0x227   :  { %171 = vadd.xlane.f32.xlu1 %v259_v27  ;;  %v261_v29 = vpop.eup %260 }
 0x228   :  { %v177_v31 = vmul.f32 %v261_v29, %v173_v30 }
 0x2b4   :  { %v172_v32 = vpop.xlane.xlu1 %171 }
 0x2b5   :  { %v178_v33 = vadd.f32 %v177_v31, %v172_v32 }
 0x2b7   :  { %180 = vst.msk [vmem:[#allocation3] sm:$0xff] %vm36_vm1, %v178_v33 }
 0x2be   :  { %v186_v35 = vld [vmem:[#allocation3] sm:$0xff] }
 0x2bf   :  { %262 = vlog2.f32 %v186_v35 }
 0x2c0   :  { %264 = vrcp.f32 %v192_v36 }
 0x2c9   :  { %v263_v37 = vpop.eup %262 }
 0x2ca   :  { %v188_v38 = vmul.f32 0.6931472, %v263_v37  ;;  %v265_v43 = vpop.eup %264 }
 0x2cc   :  { %v189_v40 = vadd.f32 %v188_v38, %v185_v39 }
 0x2ce   :  { %v194_v42 = vmul.f32 %v190_v34, %v189_v40 }
 0x2d0   :  { %v195_v44 = vsub.f32 %v193_v41, %v194_v42 }
 0x2d2   :  { %v197_v45 = vmul.f32 %v265_v43, %v195_v44 }
 0x2d4   :  { %v198_v46 = vmul.f32 -1.0, %v197_v45 }
 0x2d6   :  { %199 = vst.msk [vmem:[%s355_s4] sm:$0xff] %vm36_vm1, %v198_v46 }
 0x2d7   :  { %204 = vsyncpa [#allocation5], 1 }

</bundles_post_ra>
